<compile_context>
chip_gen: v7x
topology: tpu7x:2x2x1
jax: 0.10.0
libtpu: 0.0.40
codegen_flags: <defaults>
</compile_context>

<pallas_src>
import functools

import jax
import jax.numpy as jnp
from jax.experimental import pallas as pl
from jax.experimental.pallas import tpu as pltpu


def _round_up(n, m):
    return ((n + m - 1) // m) * m


def idec_kernel(inv_alpha, power, x_ref, w_enc_ref, b_enc_ref, cent_ref,
                c_sq_ref, w_dec_ref, b_dec_ref, q_ref, xrec_ref):
    # ---- encoder: z = relu(x @ W_enc + b_enc) -------------------------------
    z = jnp.dot(x_ref[...], w_enc_ref[...],
                preferred_element_type=jnp.float32)            # [TB, H] f32
    z = jnp.maximum(z + b_enc_ref[...], 0.0)

    # ---- cluster assignment (Student's t-distribution soft labels) ---------
    # diff[b,k] = ||z_b - c_k||^2 = ||z_b||^2 + ||c_k||^2 - 2 z_b.c_k
    # ||c_k||^2 is precomputed in the wrapper (loop invariant); the cross term
    # contracts H against H directly (no materialized transpose).
    c = cent_ref[...]                                          # [K, H] f32
    z_sq = jnp.sum(z * z, axis=1, keepdims=True)               # [TB, 1]
    cross = jax.lax.dot_general(
        z, c, dimension_numbers=(((1,), (1,)), ((), ())),
        preferred_element_type=jnp.float32)                    # [TB, K]
    diff = jnp.maximum(z_sq + c_sq_ref[...] - 2.0 * cross, 0.0)

    numerator = pl.reciprocal(1.0 + diff * inv_alpha, approx=True)
    if power != 1.0:  # trace-time specialization; alpha == 1.0 -> no-op
        numerator = jnp.exp(power * jnp.log(numerator))
    q_ref[...] = numerator * pl.reciprocal(
        jnp.sum(numerator, axis=1, keepdims=True), approx=True)

    # ---- decoder: x_rec = z @ W_dec + b_dec ---------------------------------
    xrec_ref[...] = (jnp.dot(z.astype(w_dec_ref.dtype), w_dec_ref[...],
                             preferred_element_type=jnp.float32)
                     + b_dec_ref[...])


def idec_forward(x, w_enc, b_enc, centroids, w_dec, b_dec, alpha=1.0,
                 block_b=512, mxu_dtype=jnp.bfloat16):
    B, D = x.shape
    K, H = centroids.shape

    x = jnp.asarray(x, jnp.float32)
    b_enc = jnp.asarray(b_enc, jnp.float32).reshape(1, H)
    b_dec = jnp.asarray(b_dec, jnp.float32).reshape(1, D)
    centroids = jnp.asarray(centroids, jnp.float32)

    # Batch tile: multiple of 8 sublanes, no larger than the (padded) batch.
    block_b = max(8, min(_round_up(block_b, 8), _round_up(B, 8)))
    b_pad = _round_up(B, block_b)
    if b_pad != B:
        x = jnp.pad(x, ((0, b_pad - B), (0, 0)))

    # Narrow MXU operands (halves HBM traffic; bf16 MXU path on v6e/v7x).
    x_m = x.astype(mxu_dtype)
    w_enc_m = jnp.asarray(w_enc).astype(mxu_dtype)
    w_dec_m = jnp.asarray(w_dec).astype(mxu_dtype)
    # Loop-invariant ||c_k||^2, precomputed once outside the grid.
    c_sq = jnp.sum(centroids * centroids, axis=1).reshape(1, K)

    grid = (b_pad // block_b,)
    const = lambda i: (0, 0)        # VMEM-resident across the batch grid
    batch_row = lambda i: (i, 0)    # per-batch-tile

    itemsize = jnp.dtype(mxu_dtype).itemsize
    flops = 2 * b_pad * (D * H + H * K + H * D)
    bytes_accessed = (
        b_pad * D * itemsize                                   # x
        + (D * H + H * D) * itemsize                           # weights
        + 4 * (H + D + K * H + K)                              # biases, c, ||c||^2
        + 4 * (b_pad * K + b_pad * D))                         # q, x_rec

    q, x_rec = pl.pallas_call(
        functools.partial(idec_kernel,
                          float(1.0 / alpha),
                          float((alpha + 1.0) / 2.0)),
        out_shape=(
            jax.ShapeDtypeStruct((b_pad, K), jnp.float32),     # q
            jax.ShapeDtypeStruct((b_pad, D), jnp.float32),     # x_rec
        ),
        grid_spec=pltpu.PrefetchScalarGridSpec(
            num_scalar_prefetch=0,
            grid=grid,
            in_specs=[
                pl.BlockSpec((block_b, D), batch_row),         # x tile
                pl.BlockSpec((D, H), const),                   # W_enc (resident)
                pl.BlockSpec((1, H), const),                   # b_enc
                pl.BlockSpec((K, H), const),                   # centroids
                pl.BlockSpec((1, K), const),                   # ||c_k||^2
                pl.BlockSpec((H, D), const),                   # W_dec (resident)
                pl.BlockSpec((1, D), const),                   # b_dec
            ],
            out_specs=(
                pl.BlockSpec((block_b, K), batch_row),         # q tile
                pl.BlockSpec((block_b, D), batch_row),         # x_rec tile
            ),
        ),
        compiler_params=pltpu.CompilerParams(
            dimension_semantics=("parallel",)),
        cost_estimate=pl.CostEstimate(
            flops=flops,
            transcendentals=2 * b_pad * K,
            bytes_accessed=bytes_accessed),
    )(x_m, w_enc_m, b_enc, centroids, c_sq, w_dec_m, b_dec)

    if b_pad != B:
        q = q[:B]
        x_rec = x_rec[:B]
    return q, x_rec


def _reference(x, w_enc, b_enc, centroids, w_dec, b_dec, alpha, mxu_dtype):
    """Pure-JAX reference mirroring the module (bf16 MXU operands, f32 math)."""
    z = jnp.dot(x.astype(mxu_dtype), w_enc.astype(mxu_dtype),
                preferred_element_type=jnp.float32) + b_enc.reshape(1, -1)
    z = jnp.maximum(z, 0.0)
    diff = jnp.sum((z[:, None, :] - centroids[None, :, :]) ** 2, axis=2)
    numerator = 1.0 / (1.0 + diff / alpha)
    power = (alpha + 1.0) / 2.0
    numerator = numerator ** power
    q = numerator / jnp.sum(numerator, axis=1, keepdims=True)
    x_rec = jnp.dot(z.astype(mxu_dtype), w_dec.astype(mxu_dtype),
                    preferred_element_type=jnp.float32) + b_dec.reshape(1, -1)
    return q, x_rec


if __name__ == "__main__":
    # Small deterministic shapes consistent with the module's forward
    # (x: [batch, embedding_dim]); batch large enough to exercise the grid.
    B, D, H, K = 256, 32, 16, 10
    alpha = 1.0
    TB = 64                      # 4 grid steps

    key = jax.random.PRNGKey(0)
    k_x, k_we, k_c, k_wd = jax.random.split(key, 4)

    x = jax.random.normal(k_x, (B, D), dtype=jnp.float32)

    def uniform_init(k, shape, fan_in, fan_out):
        limit = (6.0 / (fan_in + fan_out)) ** 0.5
        return jax.random.uniform(k, shape, jnp.float32, -limit, limit)

    w_enc = uniform_init(k_we, (D, H), D, H)
    b_enc = jnp.zeros((1, H), jnp.float32)
    w_dec = uniform_init(k_wd, (H, D), H, D)
    b_dec = jnp.zeros((1, D), jnp.float32)

    # Cluster centroids: Xavier-uniform over (num_cluster, hidden_dim),
    # matching nn.init.xavier_uniform_ in the reference __init__.
    centroids = uniform_init(k_c, (K, H), H, K)

    q, x_rec = idec_forward(x, w_enc, b_enc, centroids, w_dec, b_dec,
                            alpha=alpha, block_b=TB)
    jax.block_until_ready((q, x_rec))

    q_ref, x_rec_ref = _reference(x, w_enc, b_enc, centroids, w_dec, b_dec,
                                  alpha, jnp.bfloat16)

    assert q.shape == (B, K) and x_rec.shape == (B, D)
    assert jnp.allclose(jnp.sum(q, axis=1), 1.0, atol=5e-3)
    assert jnp.allclose(q, q_ref, atol=1e-2, rtol=1e-2)
    assert jnp.allclose(x_rec, x_rec_ref, atol=5e-3, rtol=5e-3)

    print("KERNEL_OK")
</pallas_src>

<mosaic_0001>
module attributes {stable_mosaic.version = 11 : i64} {
  func.func @idec_kernel(%arg0: i32, %arg1: memref<64x32xbf16, #tpu.memory_space<vmem>>, %arg2: memref<32x16xbf16, #tpu.memory_space<vmem>>, %arg3: memref<1x16xf32, #tpu.memory_space<vmem>>, %arg4: memref<10x16xf32, #tpu.memory_space<vmem>>, %arg5: memref<1x10xf32, #tpu.memory_space<vmem>>, %arg6: memref<16x32xbf16, #tpu.memory_space<vmem>>, %arg7: memref<1x32xf32, #tpu.memory_space<vmem>>, %arg8: memref<64x10xf32, #tpu.memory_space<vmem>>, %arg9: memref<64x32xf32, #tpu.memory_space<vmem>>) attributes {dimension_semantics = [#tpu.dimension_semantics<parallel>], iteration_bounds = array<i64: 4>, scalar_prefetch = 0 : i64, scratch_operands = 0 : i64, tpu.core_type = #tpu.core_type<tc>, window_params = [{transform_indices = @transform_0, window_bounds = array<i64: 64, 32>}, {pipeline_mode = #tpu.pipeline_mode<synchronous>, transform_indices = @transform_1, window_bounds = array<i64: 32, 16>}, {pipeline_mode = #tpu.pipeline_mode<synchronous>, transform_indices = @transform_2, window_bounds = array<i64: 1, 16>}, {pipeline_mode = #tpu.pipeline_mode<synchronous>, transform_indices = @transform_3, window_bounds = array<i64: 10, 16>}, {pipeline_mode = #tpu.pipeline_mode<synchronous>, transform_indices = @transform_4, window_bounds = array<i64: 1, 10>}, {pipeline_mode = #tpu.pipeline_mode<synchronous>, transform_indices = @transform_5, window_bounds = array<i64: 16, 32>}, {pipeline_mode = #tpu.pipeline_mode<synchronous>, transform_indices = @transform_6, window_bounds = array<i64: 1, 32>}, {transform_indices = @transform_7, window_bounds = array<i64: 64, 10>}, {transform_indices = @transform_8, window_bounds = array<i64: 64, 32>}]} {
    %c0 = arith.constant 0 : index
    %c0_0 = arith.constant 0 : index
    %0 = vector.load %arg1[%c0, %c0_0] : memref<64x32xbf16, #tpu.memory_space<vmem>>, vector<64x32xbf16>
    %c0_1 = arith.constant 0 : index
    %c0_2 = arith.constant 0 : index
    %1 = vector.load %arg2[%c0_1, %c0_2] : memref<32x16xbf16, #tpu.memory_space<vmem>>, vector<32x16xbf16>
    %cst = arith.constant dense<0.000000e+00> : vector<64x16xf32>
    %2 = tpu.matmul %0, %1, %cst {dimension_numbers = #tpu.dot_dimension_numbers<[1], [0], [0], [1], [0, 0, 1, 1], [], []>} : vector<64x32xbf16>, vector<32x16xbf16>, vector<64x16xf32> -> vector<64x16xf32>
    %c0_3 = arith.constant 0 : index
    %c0_4 = arith.constant 0 : index
    %3 = vector.load %arg3[%c0_3, %c0_4] : memref<1x16xf32, #tpu.memory_space<vmem>>, vector<1x16xf32>
    %4 = vector.broadcast %3 : vector<1x16xf32> to vector<64x16xf32>
    %5 = arith.addf %2, %4 : vector<64x16xf32>
    %cst_5 = arith.constant 0.000000e+00 : f32
    %6 = vector.broadcast %cst_5 : f32 to vector<64x16xf32>
    %7 = arith.maximumf %5, %6 : vector<64x16xf32>
    %c0_6 = arith.constant 0 : index
    %c0_7 = arith.constant 0 : index
    %8 = vector.load %arg4[%c0_6, %c0_7] : memref<10x16xf32, #tpu.memory_space<vmem>>, vector<10x16xf32>
    %9 = arith.mulf %7, %7 : vector<64x16xf32>
    %cst_8 = arith.constant dense<0.000000e+00> : vector<64xf32>
    %10 = vector.multi_reduction <add>, %9, %cst_8 [1] : vector<64x16xf32> to vector<64xf32>
    %11 = vector.shape_cast %10 : vector<64xf32> to vector<64x1xf32>
    %cst_9 = arith.constant dense<0.000000e+00> : vector<64x10xf32>
    %12 = tpu.matmul %7, %8, %cst_9 {dimension_numbers = #tpu.dot_dimension_numbers<[1], [1], [0], [0], [0, 0, 1, 0], [], []>} : vector<64x16xf32>, vector<10x16xf32>, vector<64x10xf32> -> vector<64x10xf32>
    %c0_10 = arith.constant 0 : index
    %c0_11 = arith.constant 0 : index
    %13 = vector.load %arg5[%c0_10, %c0_11] : memref<1x10xf32, #tpu.memory_space<vmem>>, vector<1x10xf32>
    %14 = vector.broadcast %11 : vector<64x1xf32> to vector<64x10xf32>
    %15 = vector.broadcast %13 : vector<1x10xf32> to vector<64x10xf32>
    %16 = arith.addf %14, %15 : vector<64x10xf32>
    %cst_12 = arith.constant 2.000000e+00 : f32
    %17 = vector.broadcast %cst_12 : f32 to vector<64x10xf32>
    %18 = arith.mulf %17, %12 : vector<64x10xf32>
    %19 = arith.subf %16, %18 : vector<64x10xf32>
    %cst_13 = arith.constant 0.000000e+00 : f32
    %20 = vector.broadcast %cst_13 : f32 to vector<64x10xf32>
    %21 = arith.maximumf %19, %20 : vector<64x10xf32>
    %cst_14 = arith.constant 1.000000e+00 : f32
    %22 = vector.broadcast %cst_14 : f32 to vector<64x10xf32>
    %23 = arith.mulf %21, %22 : vector<64x10xf32>
    %cst_15 = arith.constant 1.000000e+00 : f32
    %24 = vector.broadcast %cst_15 : f32 to vector<64x10xf32>
    %25 = arith.addf %24, %23 : vector<64x10xf32>
    %26 = tpu.reciprocal %25 {approx = true} : vector<64x10xf32> -> vector<64x10xf32>
    %cst_16 = arith.constant dense<0.000000e+00> : vector<64xf32>
    %27 = vector.multi_reduction <add>, %26, %cst_16 [1] : vector<64x10xf32> to vector<64xf32>
    %28 = vector.shape_cast %27 : vector<64xf32> to vector<64x1xf32>
    %29 = tpu.reciprocal %28 {approx = true} : vector<64x1xf32> -> vector<64x1xf32>
    %30 = vector.broadcast %29 : vector<64x1xf32> to vector<64x10xf32>
    %31 = arith.mulf %26, %30 : vector<64x10xf32>
    %c0_17 = arith.constant 0 : index
    %c0_18 = arith.constant 0 : index
    %32 = vector.load %arg8[%c0_17, %c0_18] : memref<64x10xf32, #tpu.memory_space<vmem>>, vector<64x10xf32>
    tpu.vector_store %arg8[%c0_17, %c0_18], %31 {strides = array<i32>} : memref<64x10xf32, #tpu.memory_space<vmem>>, vector<64x10xf32>,
    %33 = arith.truncf %7 : vector<64x16xf32> to vector<64x16xbf16>
    %c0_19 = arith.constant 0 : index
    %c0_20 = arith.constant 0 : index
    %34 = vector.load %arg6[%c0_19, %c0_20] : memref<16x32xbf16, #tpu.memory_space<vmem>>, vector<16x32xbf16>
    %cst_21 = arith.constant dense<0.000000e+00> : vector<64x32xf32>
    %35 = tpu.matmul %33, %34, %cst_21 {dimension_numbers = #tpu.dot_dimension_numbers<[1], [0], [0], [1], [0, 0, 1, 1], [], []>} : vector<64x16xbf16>, vector<16x32xbf16>, vector<64x32xf32> -> vector<64x32xf32>
    %c0_22 = arith.constant 0 : index
    %c0_23 = arith.constant 0 : index
    %36 = vector.load %arg7[%c0_22, %c0_23] : memref<1x32xf32, #tpu.memory_space<vmem>>, vector<1x32xf32>
    %37 = vector.broadcast %36 : vector<1x32xf32> to vector<64x32xf32>
    %38 = arith.addf %35, %37 : vector<64x32xf32>
    %c0_24 = arith.constant 0 : index
    %c0_25 = arith.constant 0 : index
    %39 = vector.load %arg9[%c0_24, %c0_25] : memref<64x32xf32, #tpu.memory_space<vmem>>, vector<64x32xf32>
    tpu.vector_store %arg9[%c0_24, %c0_25], %38 {strides = array<i32>} : memref<64x32xf32, #tpu.memory_space<vmem>>, vector<64x32xf32>,
    return
  }
  func.func @transform_0(%arg0: i32) -> (i32, i32) {
    %c0_i32 = arith.constant 0 : i32
    %c0_i32_0 = arith.constant 0 : i32
    return %arg0, %c0_i32 : i32, i32
  }
  func.func @transform_1(%arg0: i32) -> (i32, i32) {
    %c0_i32 = arith.constant 0 : i32
    %c0_i32_0 = arith.constant 0 : i32
    %c0_i32_1 = arith.constant 0 : i32
    return %c0_i32, %c0_i32_0 : i32, i32
  }
  func.func @transform_2(%arg0: i32) -> (i32, i32) {
    %c0_i32 = arith.constant 0 : i32
    %c0_i32_0 = arith.constant 0 : i32
    %c0_i32_1 = arith.constant 0 : i32
    return %c0_i32, %c0_i32_0 : i32, i32
  }
  func.func @transform_3(%arg0: i32) -> (i32, i32) {
    %c0_i32 = arith.constant 0 : i32
    %c0_i32_0 = arith.constant 0 : i32
    %c0_i32_1 = arith.constant 0 : i32
    return %c0_i32, %c0_i32_0 : i32, i32
  }
  func.func @transform_4(%arg0: i32) -> (i32, i32) {
    %c0_i32 = arith.constant 0 : i32
    %c0_i32_0 = arith.constant 0 : i32
    %c0_i32_1 = arith.constant 0 : i32
    return %c0_i32, %c0_i32_0 : i32, i32
  }
  func.func @transform_5(%arg0: i32) -> (i32, i32) {
    %c0_i32 = arith.constant 0 : i32
    %c0_i32_0 = arith.constant 0 : i32
    %c0_i32_1 = arith.constant 0 : i32
    return %c0_i32, %c0_i32_0 : i32, i32
  }
  func.func @transform_6(%arg0: i32) -> (i32, i32) {
    %c0_i32 = arith.constant 0 : i32
    %c0_i32_0 = arith.constant 0 : i32
    %c0_i32_1 = arith.constant 0 : i32
    return %c0_i32, %c0_i32_0 : i32, i32
  }
  func.func @transform_7(%arg0: i32) -> (i32, i32) {
    %c0_i32 = arith.constant 0 : i32
    %c0_i32_0 = arith.constant 0 : i32
    return %arg0, %c0_i32 : i32, i32
  }
  func.func @transform_8(%arg0: i32) -> (i32, i32) {
    %c0_i32 = arith.constant 0 : i32
    %c0_i32_0 = arith.constant 0 : i32
    return %arg0, %c0_i32 : i32, i32
  }
}

</mosaic_0001>

<bundles_post_ra>
// kernel: tpu_custom_call.1
= control target key start
LH: loop header
LB: loop body
LE: loop exit
PB: predicated region body
PF: predicated region fallthrough
CT: control target
= control target key end

     0   :  { %s1139_s27 = smov 0   ;;  %s1261_s0 = inlined_call_operand.vmem [shape: bf16[256,32], index: 0, kind: input, shape index: {}]   ;;  %s1262_s1 = inlined_call_operand.vmem [shape: bf16[32,16], index: 1, kind: input, shape index: {}]   ;;  %s1263_s2 = inlined_call_operand.vmem [shape: f32[1,16], index: 2, kind: input, shape index: {}]   ;;  %s1264_s3 = inlined_call_operand.vmem [shape: f32[10,16], index: 3, kind: input, shape index: {}]   ;;  %s1265_s4 = inlined_call_operand.vmem [shape: f32[1,10], index: 4, kind: input, shape index: {}]   ;;  %s1266_s5 = inlined_call_operand.vmem [shape: bf16[16,32], index: 5, kind: input, shape index: {}]   ;;  %s1267_s6 = inlined_call_operand.vmem [shape: f32[1,32], index: 6, kind: input, shape index: {}]   ;;  %s1268_s7 = inlined_call_operand.vmem [shape: f32[256,10], index: 7, kind: output, shape index: {0}]   ;;  %s1269_s8 = inlined_call_operand.vmem [shape: f32[256,32], index: 8, kind: output, shape index: {1}]  }
   0x1 LB: > { %s929_s28 = sadd.s32 4294967295, %s1092_s27   ;;  %p933_p0 = scmp.ge.s32.totalorder %s1092_s27, 1  ;;  %s1092_s27 = sphi %s1139_s27, %s19_s27  }
   0x2   : > { %p266_p1 = scmp.lt.s32.totalorder %s1092_s27, 5 }
   0x4   : > { %p267_p2 = pnand %p933_p0, %p266_p1 }
   0x5   : > { %v1047_v0 = vld [vmem:[%s1262_s1] sm:$0xff] (!%p267_p2)   ;;  %s934_s9 = sshll.u32 (!%p267_p2), %s929_s28, 3  ;;  %v1048_v1 = vld [vmem:[%s1262_s1 + $0x8] sm:$0xff] (!%p267_p2)   ;;  %vm471_vm0 = vcmask (!%p267_p2), 130048   ;;  %vm375_vm2 = vcmask (!%p267_p2), 261120   ;;  %vm686_vm3 = vcmask (!%p267_p2), 80896  }
   0x6   : > { %270 = sbr.rel (%p267_p2) target bundleno = 638 (0x27e), region = 48  ;;  %p306_p3 = scmp.lt.s32.totalorder (!%p267_p2), %s934_s9, 31  ;;  %991 = vmatprep.subr.bf16.mxu0 (!%p267_p2), %v1047_v0  ;;  %1035 = vmatprep.subr.bf16.mxu1 (!%p267_p2), %v1047_v0  ;;  %v461_v2 = vld [vmem:[%s1264_s3] sm:$0xff] (!%p267_p2)  ;;  %v462_v3 = vld [vmem:[%s1264_s3 + $0x8] sm:$0x3] (!%p267_p2)  ;;  %vm1030_vm1 = vmpackc.low (!%p267_p2), %vm471_vm0, %vm471_vm0 }
   0x7   : > { %992 = vmatpush3.bf16.msra.mxu0 (!%p267_p2), %v1047_v0  ;;  %1037 = vmatpush3.bf16.msra.mxu1 (!%p267_p2), %v1047_v0  ;;  %v1029_v4 = vpack.c.bf16 (!%p267_p2), %v462_v3, %v461_v2  ;;  %v1053_v9 = vld [vmem:[%s1266_s5] sm:$0xff] (!%p267_p2)  }
   0x8   : > { %993 = vmatprep.subr.bf16.mxu0 (!%p267_p2), %v1048_v1  ;;  %1036 = vmatprep.subr.bf16.mxu1 (!%p267_p2), %v1048_v1  ;;  %v940_v10 = vld [vmem:[%s1263_s2] ss:$0 sm:$0xff] (!%p267_p2) }
   0x9   : > { %v961_v60 = vld [vmem:[%s1265_s4] ss:$0 sm:$0xff] (!%p267_p2) }
   0xb   : > { %994 = vmatpush3.bf16.msra.mxu0 (!%p267_p2), %v1048_v1  ;;  %1038 = vmatpush3.bf16.msra.mxu1 (!%p267_p2), %v1048_v1  ;;  %v1204_v1 = vld [vmem:[%s1267_s6] ss:$0 sm:$0xff] (!%p267_p2) }
   0xc   : > { %1031 = vmatprep.subr.msk.bf16.mxu1 (!%p267_p2), %vm1030_vm1, %v1029_v4  ;;  %1019 = vmatprep.subr.bf16.mxu0 (!%p267_p2), %v1053_v9 }
   0xd   : > { %s1271_s9 = smov (!%p306_p3, %s934_s9), 31 }
   0xe   : > { %s935_s16 = sshll.u32 %s1271_s9, 2  ;;  %s937_s26 = sshll.u32 %s1271_s9, 3 }
   0xf   : > { %s309_s19 = scalar_lea.vmem %s1261_s0, %s935_s16  ;;  %s1211_s11 = scalar_lea.vmem %s1269_s8, %s937_s26 }
  0x10   : > { %v1049_v5 = vld [vmem:[%s309_s19] sm:$0xff]   ;;  %v1050_v6 = vld [vmem:[%s309_s19 + $0x8] sm:$0xff]   ;;  %v1051_v7 = vld [vmem:[%s309_s19 + $0x10] sm:$0xff]   ;;  %s315_s14 = scalar_lea.vmem %s1268_s7, %s937_s26 }
  0x11   : > { %995 = vmatprep.mubr.msk.bf16.mxu0 %vm375_vm2, %v1049_v5  ;;  %v1052_v8 = vld [vmem:[%s309_s19 + $0x18] sm:$0xff]   ;;  %999 = vmatprep.mubr.msk.bf16.mxu1 %vm375_vm2, %v1051_v7 }
  0x12   : > { %996 = vmatmul.mubr.msk.bf16.vlgmr.msra.gmra.mrb[0].mxu0 %vm375_vm2, %v1050_v6  ;;  %1000 = vmatmul.mubr.msk.bf16.vlgmr.msra.gmra.mrb[0].mxu1 %vm375_vm2, %v1052_v8 }
  0x13   : > { %1020 = vmatpush3.bf16.msra.mxu0 %v1053_v9 }
  0x14   : > { %1034 = vmatpush3.bf16.xpose.msk.msra.mxu1 %vm1030_vm1, %v1029_v4 }
  0xe5   : > { %v997_v11 = vpop.f32.mrb[0].mxu0  ;;  %v1001_v16 = vpop.f32.mrb[0].mxu1 }
  0xe6   : > { %v431_v12 = vadd.f32 %v997_v11, %v940_v10  ;;  %v422_v13 = vpop.f32.mrb[1].mxu0  ;;  %v447_v20 = vadd.f32 %v1001_v16, %v940_v10  ;;  %v438_v21 = vpop.f32.mrb[1].mxu1 }
  0xe7   : > { %v423_v14 = vadd.f32 %v940_v10, %v422_v13  ;;  %v998_v15 = vpop.f32.mrb[2].mxu0  ;;  %v439_v24 = vadd.f32 %v940_v10, %v438_v21  ;;  %v1002_v25 = vpop.f32.mrb[2].mxu1 }
  0xe8   : > { %v455_v17 = vmax.f32 %v431_v12, 0.0  ;;  %v434_v18 = vadd.f32 %v998_v15, %v940_v10  ;;  %v425_v19 = vpop.f32.mrb[3].mxu0  ;;  %v459_v27 = vmax.f32 %v447_v20, 0.0  ;;  %v450_v28 = vadd.f32 %v1002_v25, %v940_v10  ;;  %v441_v29 = vpop.f32.mrb[3].mxu1 }
  0xe9   : > { %v453_v22 = vmax.f32 %v423_v14, 0.0  ;;  %v426_v23 = vadd.f32 %v940_v10, %v425_v19  ;;  %v457_v32 = vmax.f32 %v439_v24, 0.0  ;;  %v442_v33 = vadd.f32 %v940_v10, %v441_v29 }
  0xea   : > { %v456_v26 = vmax.f32 %v434_v18, 0.0  ;;  %v465_v30 = vmul.f32 %v455_v17, %v455_v17  ;;  %v460_v36 = vmax.f32 %v450_v28, 0.0  ;;  %v469_v52 = vmul.f32 %v459_v27, %v459_v27 }
  0xeb   : > { %v454_v31 = vmax.f32 %v426_v23, 0.0  ;;  %1007 = vmatprep.mubr.msk.f32.mxu1 %vm471_vm0, %v453_v22  ;;  %v463_v34 = vmul.f32 %v453_v22, %v453_v22  ;;  %v458_v40 = vmax.f32 %v442_v33, 0.0  ;;  %v467_v42 = vmul.f32 %v457_v32, %v457_v32 }
  0xec   : > { %v736_v35 = vpack.c.bf16 %v456_v26, %v455_v17  ;;  %v478_v37 = vsel %vm471_vm0, %v465_v30, 0.0  ;;  %v466_v38 = vmul.f32 %v456_v26, %v456_v26  ;;  %v738_v43 = vpack.c.bf16 %v460_v36, %v459_v27 }
  0xed   : > { %v735_v39 = vpack.c.bf16 %v454_v31, %v453_v22  ;;  %479 = vadd.xlane.f32.xlu1 %v478_v37  ;;  %1008 = vmatmul.mubr.msk.f32.vlgmr.msra.gmra.mrb[4].mxu1 %vm471_vm0, %v454_v31  ;;  %v472_v41 = vsel %vm471_vm0, %v463_v34, 0.0  ;;  %v737_v44 = vpack.c.bf16 %v458_v40, %v457_v32  ;;  %v484_v45 = vsel %vm471_vm0, %v467_v42, 0.0 }
  0xee   : > { %1010 = vmatprep.mubr.msk.f32.mxu1 %vm471_vm0, %v455_v17  ;;  %473 = vadd.xlane.f32.xlu0 %v472_v41  ;;  %v468_v46 = vmul.f32 %v458_v40, %v458_v40  ;;  %v481_v47 = vsel %vm471_vm0, %v466_v38, 0.0  ;;  %v464_v48 = vmul.f32 %v454_v31, %v454_v31  ;;  %v470_v50 = vmul.f32 %v460_v36, %v460_v36 }
  0xef   : > { %1021 = vmatprep.mubr.msk.bf16.mxu0 %vm471_vm0, %v735_v39  ;;  %v490_v54 = vsel %vm471_vm0, %v469_v52, 0.0 }
  0xf0   : > { %1022 = vmatmul.mubr.msk.bf16.vlgmr.msra.gmra.mrb[4].mxu0 %vm471_vm0, %v736_v35  ;;  %v487_v49 = vsel %vm471_vm0, %v468_v46, 0.0  ;;  %v475_v51 = vsel %vm471_vm0, %v464_v48, 0.0  ;;  %v493_v53 = vsel %vm471_vm0, %v470_v50, 0.0 }
  0xf1   : > { %482 = vadd.xlane.f32.xlu1 %v481_v47  ;;  %1011 = vmatmul.mubr.msk.f32.gmra.mrb[6].mxu1 %vm471_vm0, %v456_v26 }
  0xf2   : > { %1013 = vmatprep.mubr.msk.f32.mxu1 %vm471_vm0, %v457_v32  ;;  %485 = vadd.xlane.f32.xlu0 %v484_v45 }
  0xf3   : > { %1025 = vmatprep.mubr.msk.bf16.mxu0 %vm471_vm0, %v737_v44 }
  0xf5   : > { %488 = vadd.xlane.f32.xlu1 %v487_v49  ;;  %1014 = vmatmul.mubr.msk.f32.gmra.mrb[8].mxu1 %vm471_vm0, %v458_v40 }
  0xf6   : > { %1016 = vmatprep.mubr.msk.f32.mxu1 %vm471_vm0, %v459_v27  ;;  %476 = vadd.xlane.f32.xlu0 %v475_v51 }
  0xf8   : > { %1026 = vmatmul.mubr.msk.bf16.gmra.mrb[8].mxu0 %vm471_vm0, %v738_v43 }
  0xf9   : > { %494 = vadd.xlane.f32.xlu1 %v493_v53  ;;  %1017 = vmatmul.mubr.msk.f32.gmra.mrb[10].mxu1 %vm471_vm0, %v460_v36 }
  0xfa   : > { %491 = vadd.xlane.f32.xlu0 %v490_v54 }
 0x17a   : > { %v480_v56 = vpop.xlane.xlu1 %479 }
 0x17b   : > { %v474_v55 = vpop.xlane.xlu0 %473  ;;  %v640_v17 = vadd.f32 %v961_v60, %v480_v56 }
 0x17c   : > { %v638_v2 = vadd.f32 %v961_v60, %v474_v55 }
 0x17e   : > { %v483_v58 = vpop.xlane.xlu1 %482 }
 0x17f   : > { %v486_v57 = vpop.xlane.xlu0 %485  ;;  %v641_v11 = vadd.f32 %v961_v60, %v483_v58 }
 0x180   : > { %v642_v34 = vadd.f32 %v961_v60, %v486_v57 }
 0x182   : > { %v489_v3 = vpop.xlane.xlu1 %488 }
 0x183   : > { %v477_v59 = vpop.xlane.xlu0 %476  ;;  %v643_v29 = vadd.f32 %v961_v60, %v489_v3 }
 0x184   : > { %v639_v62 = vadd.f32 %v961_v60, %v477_v59 }
 0x186   : > { %v495_v25 = vpop.xlane.xlu1 %494 }
 0x187   : > { %v492_v30 = vpop.xlane.xlu0 %491  ;;  %v645_v37 = vadd.f32 %v961_v60, %v495_v25 }
 0x188   : > { %v644_v41 = vadd.f32 %v961_v60, %v492_v30 }
 0x1c0   : > { %v1009_v61 = vpop.f32.mrb[4].mxu1 }
 0x1c1   : > { %v647_v63 = vmul.f32 2.0, %v1009_v61  ;;  %v592_v0 = vpop.f32.mrb[5].mxu1 }
 0x1c2   : > { %v646_v4 = vmul.f32 2.0, %v592_v0 }
 0x1c3   : > { %v655_v5 = vsub.f32 %v639_v62, %v647_v63  ;;  %v1023_v6 = vpop.f32.mrb[4].mxu0 }
 0x1c4   : > { %v654_v7 = vsub.f32 %v638_v2, %v646_v4  ;;  %v809_v8 = vadd.f32 %v1023_v6, %v1204_v1  ;;  %v1012_v9 = vpop.f32.mrb[6].mxu1  ;;  %v800_v10 = vpop.f32.mrb[5].mxu0 }
 0x1c5   : > { %v663_v12 = vmax.f32 %v655_v5, 0.0  ;;  %v649_v13 = vmul.f32 2.0, %v1012_v9  ;;  %v801_v14 = vadd.f32 %v1204_v1, %v800_v10  ;;  %v602_v15 = vpop.f32.mrb[7].mxu1  ;;  %v1024_v16 = vpop.f32.mrb[6].mxu0 }
 0x1c6   : > { %v662_v18 = vmax.f32 %v654_v7, 0.0  ;;  %833 = vst.msk [vmem:[%s1211_s11 + $0x10] sm:$0xff] %vm375_vm2, %v809_v8  ;;  %v648_v19 = vmul.f32 2.0, %v602_v15  ;;  %v812_v20 = vadd.f32 %v1024_v16, %v1204_v1  ;;  %v803_v21 = vpop.f32.mrb[7].mxu0 }
 0x1c7   : > { %v671_v22 = vadd.f32 1.0, %v663_v12  ;;  %v657_v23 = vsub.f32 %v641_v11, %v649_v13  ;;  %831 = vst.msk [vmem:[%s1211_s11] sm:$0xff] %vm375_vm2, %v801_v14  ;;  %v804_v24 = vadd.f32 %v1204_v1, %v803_v21 }
 0x1c8   : > { %v670_v26 = vadd.f32 1.0, %v662_v18  ;;  %v656_v27 = vsub.f32 %v640_v17, %v648_v19  ;;  %834 = vst.msk [vmem:[%s1211_s11 + $0x18] sm:$0xff] %vm375_vm2, %v812_v20  ;;  %v1015_v28 = vpop.f32.mrb[8].mxu1 }
 0x1c9   : > { %1054 = vrcp.f32 %v671_v22  ;;  %v665_v31 = vmax.f32 %v657_v23, 0.0  ;;  %832 = vst.msk [vmem:[%s1211_s11 + $0x8] sm:$0xff] %vm375_vm2, %v804_v24  ;;  %v651_v32 = vmul.f32 2.0, %v1015_v28  ;;  %v612_v33 = vpop.f32.mrb[9].mxu1 }
 0x1ca   : > { %1056 = vrcp.f32 %v670_v26  ;;  %v664_v35 = vmax.f32 %v656_v27, 0.0  ;;  %v650_v36 = vmul.f32 2.0, %v612_v33 }
 0x1cb   : > { %v673_v38 = vadd.f32 1.0, %v665_v31  ;;  %v659_v39 = vsub.f32 %v643_v29, %v651_v32  ;;  %v1027_v40 = vpop.f32.mrb[8].mxu0 }
 0x1cc   : > { %v672_v42 = vadd.f32 1.0, %v664_v35  ;;  %v658_v43 = vsub.f32 %v642_v34, %v650_v36  ;;  %v825_v44 = vadd.f32 %v1027_v40, %v1204_v1  ;;  %v1018_v45 = vpop.f32.mrb[10].mxu1  ;;  %v816_v46 = vpop.f32.mrb[9].mxu0 }
 0x1cd   : > { %1058 = vrcp.f32 %v673_v38  ;;  %v667_v47 = vmax.f32 %v659_v39, 0.0  ;;  %v653_v48 = vmul.f32 2.0, %v1018_v45  ;;  %v817_v49 = vadd.f32 %v1204_v1, %v816_v46  ;;  %v622_v50 = vpop.f32.mrb[11].mxu1  ;;  %v1028_v51 = vpop.f32.mrb[10].mxu0 }
 0x1ce   : > { %1060 = vrcp.f32 %v672_v42  ;;  %v666_v52 = vmax.f32 %v658_v43, 0.0  ;;  %837 = vst.msk [vmem:[%s1211_s11 + $0x30] sm:$0xff] %vm375_vm2, %v825_v44  ;;  %v652_v53 = vmul.f32 2.0, %v622_v50  ;;  %v828_v54 = vadd.f32 %v1028_v51, %v1204_v1  ;;  %v819_v55 = vpop.f32.mrb[11].mxu0 }
 0x1cf   : > { %v675_v56 = vadd.f32 1.0, %v667_v47  ;;  %v661_v57 = vsub.f32 %v645_v37, %v653_v48  ;;  %835 = vst.msk [vmem:[%s1211_s11 + $0x20] sm:$0xff] %vm375_vm2, %v817_v49  ;;  %v820_v58 = vadd.f32 %v1204_v1, %v819_v55 }
 0x1d0   : > { %v674_v59 = vadd.f32 1.0, %v666_v52  ;;  %v660_v60 = vsub.f32 %v644_v41, %v652_v53  ;;  %838 = vst.msk [vmem:[%s1211_s11 + $0x38] sm:$0xff] %vm375_vm2, %v828_v54 }
 0x1d1   : > { %1062 = vrcp.f32 %v675_v56  ;;  %v669_v61 = vmax.f32 %v661_v57, 0.0  ;;  %836 = vst.msk [vmem:[%s1211_s11 + $0x28] sm:$0xff] %vm375_vm2, %v820_v58 }
 0x1d2   : > { %1064 = vrcp.f32 %v674_v59  ;;  %v668_v62 = vmax.f32 %v660_v60, 0.0 }
 0x1d3   : > { %v1055_v63 = vpop.eup %1054  ;;  %v677_v0 = vadd.f32 1.0, %v669_v61 }
 0x1d4   : > { %v1057_v2 = vpop.eup %1056  ;;  %v676_v3 = vadd.f32 1.0, %v668_v62  ;;  %v690_v4 = vsel %vm686_vm3, %v1055_v63, 0.0 }
 0x1d5   : > { %1066 = vrcp.f32 %v677_v0  ;;  %691 = vadd.xlane.f32.xlu1 %v690_v4  ;;  %v687_v1 = vsel %vm686_vm3, %v1057_v2, 0.0 }
 0x1d6   : > { %1068 = vrcp.f32 %v676_v3  ;;  %688 = vadd.xlane.f32.xlu0 %v687_v1 }
 0x1d7   : > { %v1059_v5 = vpop.eup %1058 }
 0x1d8   : > { %v1061_v6 = vpop.eup %1060  ;;  %v696_v7 = vsel %vm686_vm3, %v1059_v5, 0.0 }
 0x1d9   : > { %697 = vadd.xlane.f32.xlu1 %v696_v7  ;;  %v693_v8 = vsel %vm686_vm3, %v1061_v6, 0.0 }
 0x1da   : > { %694 = vadd.xlane.f32.xlu0 %v693_v8 }
 0x1db   : > { %v1063_v9 = vpop.eup %1062 }
 0x1dc   : > { %v1065_v10 = vpop.eup %1064  ;;  %v702_v11 = vsel %vm686_vm3, %v1063_v9, 0.0 }
 0x1dd   : > { %703 = vadd.xlane.f32.xlu1 %v702_v11  ;;  %v699_v12 = vsel %vm686_vm3, %v1065_v10, 0.0 }
 0x1de   : > { %700 = vadd.xlane.f32.xlu0 %v699_v12 }
 0x1df   : > { %v1067_v13 = vpop.eup %1066 }
 0x1e0   : > { %v1069_v14 = vpop.eup %1068  ;;  %v708_v15 = vsel %vm686_vm3, %v1067_v13, 0.0 }
 0x1e1   : > { %709 = vadd.xlane.f32.xlu1 %v708_v15  ;;  %v705_v16 = vsel %vm686_vm3, %v1069_v14, 0.0 }
 0x1e2   : > { %706 = vadd.xlane.f32.xlu0 %v705_v16 }
 0x262   : > { %v692_v17 = vpop.xlane.xlu1 %691 }
 0x263   : > { %1070 = vrcp.f32 %v692_v17  ;;  %v689_v18 = vpop.xlane.xlu0 %688 }
 0x264   : > { %1072 = vrcp.f32 %v689_v18 }
 0x266   : > { %v698_v19 = vpop.xlane.xlu1 %697 }
 0x267   : > { %1074 = vrcp.f32 %v698_v19  ;;  %v695_v20 = vpop.xlane.xlu0 %694 }
 0x268   : > { %1076 = vrcp.f32 %v695_v20 }
 0x26a   : > { %v704_v21 = vpop.xlane.xlu1 %703 }
 0x26b   : > { %1078 = vrcp.f32 %v704_v21  ;;  %v701_v22 = vpop.xlane.xlu0 %700 }
 0x26c   : > { %1080 = vrcp.f32 %v701_v22 }
 0x26d   : > { %v1071_v23 = vpop.eup %1070 }
 0x26e   : > { %v1073_v24 = vpop.eup %1072  ;;  %v720_v25 = vmul.f32 %v1071_v23, %v1055_v63  ;;  %v710_v26 = vpop.xlane.xlu1 %709 }
 0x26f   : > { %v719_v27 = vmul.f32 %v1073_v24, %v1057_v2  ;;  %1082 = vrcp.f32 %v710_v26  ;;  %v707_v28 = vpop.xlane.xlu0 %706 }
 0x270   : > { %728 = vst.msk [vmem:[%s315_s14 + $0x8] sm:$0xff] %vm686_vm3, %v720_v25  ;;  %1084 = vrcp.f32 %v707_v28 }
 0x271   : > { %v1075_v29 = vpop.eup %1074  ;;  %727 = vst.msk [vmem:[%s315_s14] sm:$0xff] %vm686_vm3, %v719_v27 }
 0x272   : > { %v1077_v30 = vpop.eup %1076  ;;  %v722_v31 = vmul.f32 %v1075_v29, %v1059_v5 }
 0x273   : > { %v721_v32 = vmul.f32 %v1077_v30, %v1061_v6 }
 0x274   : > { %730 = vst.msk [vmem:[%s315_s14 + $0x18] sm:$0xff] %vm686_vm3, %v722_v31 }
 0x275   : > { %v1079_v33 = vpop.eup %1078  ;;  %729 = vst.msk [vmem:[%s315_s14 + $0x10] sm:$0xff] %vm686_vm3, %v721_v32 }
 0x276   : > { %v1081_v34 = vpop.eup %1080  ;;  %v724_v35 = vmul.f32 %v1079_v33, %v1063_v9 }
 0x277   : > { %v723_v36 = vmul.f32 %v1081_v34, %v1065_v10 }
 0x278   : > { %732 = vst.msk [vmem:[%s315_s14 + $0x28] sm:$0xff] %vm686_vm3, %v724_v35 }
 0x279   : > { %v1083_v37 = vpop.eup %1082  ;;  %731 = vst.msk [vmem:[%s315_s14 + $0x20] sm:$0xff] %vm686_vm3, %v723_v36 }
 0x27a   : > { %v1085_v38 = vpop.eup %1084  ;;  %v726_v39 = vmul.f32 %v1083_v37, %v1067_v13 }
 0x27b   : > { %v725_v40 = vmul.f32 %v1085_v38, %v1069_v14 }
 0x27c   : > { %734 = vst.msk [vmem:[%s315_s14 + $0x38] sm:$0xff] %vm686_vm3, %v726_v39 }
 0x27d   : > { %733 = vst.msk [vmem:[%s315_s14 + $0x30] sm:$0xff] %vm686_vm3, %v725_v40 }
 0x27e PF: > { %s19_s27 = sadd.s32 1, %s1092_s27  }
 0x27f   : > { %p16_p4 = scmp.ge.s32.totalorder %s19_s27, 6  }
 0x281   :  { %18 = sbr.rel (!%p16_p4) target bundleno = 1 (0x1), region = 90 }

</bundles_post_ra>
